<compile_context>
chip_gen: v7x
topology: tpu7x:2x2x1
jax: 0.10.0
libtpu: 0.0.40
codegen_flags: <defaults>
</compile_context>

<pallas_src>
import functools
import math

import jax
import jax.numpy as jnp
from jax import lax
from jax.experimental import pallas as pl
from jax.experimental.pallas import tpu as pltpu


# ----------------------------------------------------------------------------
# helpers
# ----------------------------------------------------------------------------
def _round_up(x, m):
    return ((x + m - 1) // m) * m


def _class_tile_and_pad(num_classes, max_tile=4096):
    """Pick the class tile first, then pad C up to a multiple of it.

    Guarantees TC is a multiple of 128, <= max_tile, and C_pad % TC == 0,
    regardless of num_classes' factorization (no collapse to 128-wide tiles).
    """
    c128 = _round_up(num_classes, 128)
    tc = min(max_tile, c128)
    c_pad = _round_up(num_classes, tc)
    return tc, c_pad


# ----------------------------------------------------------------------------
# Pallas kernel: fused classifier stack (fc0-relu-fc1-relu-fc2) + feature norm
# (Dropout layers are eval-mode no-ops.)
# ----------------------------------------------------------------------------
def _mlp_kernel(x_ref, w0_ref, b0_ref, w1_ref, b1_ref, w2_ref, b2_ref,
                feat_ref, inv_ref):
    # bf16 operands, f32 accumulation on the MXU.
    h = jnp.dot(x_ref[...].astype(jnp.bfloat16), w0_ref[...],
                preferred_element_type=jnp.float32) + b0_ref[...]
    h = jnp.maximum(h, 0.0)
    h = jnp.dot(h.astype(jnp.bfloat16), w1_ref[...],
                preferred_element_type=jnp.float32) + b1_ref[...]
    h = jnp.maximum(h, 0.0)
    f = jnp.dot(h.astype(jnp.bfloat16), w2_ref[...],
                preferred_element_type=jnp.float32) + b2_ref[...]
    # inverse L2 norm of the features in f32 (F.normalize, eps=1e-12)
    inv_ref[...] = lax.rsqrt(
        jnp.maximum(jnp.sum(f * f, axis=-1, keepdims=True), 1e-24))
    # features handed to the ArcFace head already downcast (cast once, here,
    # instead of once per class tile inside the head grid)
    feat_ref[...] = f.astype(jnp.bfloat16)


def fused_classifier(x, params):
    """x: (B_pad, flat) f32 -> (feats (B_pad, K) bf16, inv_norm (B_pad, 1) f32)."""
    b_pad = x.shape[0]
    k = params["fc2_w"].shape[1]
    vmem = pl.BlockSpec(memory_space=pltpu.MemorySpace.VMEM)
    return pl.pallas_call(
        _mlp_kernel,
        out_shape=(jax.ShapeDtypeStruct((b_pad, k), jnp.bfloat16),
                   jax.ShapeDtypeStruct((b_pad, 1), jnp.float32)),
        in_specs=[vmem] * 7,
        out_specs=(vmem, vmem),
    )(x, params["fc0_w"], params["fc0_b"],
      params["fc1_w"], params["fc1_b"],
      params["fc2_w"], params["fc2_b"])


# ----------------------------------------------------------------------------
# Pallas kernel: ArcFace head, tiled over the class dimension
# ----------------------------------------------------------------------------
def _arc_head_kernel(x_ref, inv_ref, wt_ref, inv_wn_ref, *rest,
                     s, cos_m, sin_m, th, mm, easy_margin, with_labels,
                     block_c):
    if with_labels:
        lbl_ref, out_ref = rest
    else:
        (out_ref,) = rest

    # bf16 feats x bf16 weight tile, f32 accumulation; scaled by precomputed
    # f32 inverse norms (outer product) -- no normalized copies materialized.
    raw = jnp.dot(x_ref[...], wt_ref[...],
                  preferred_element_type=jnp.float32)          # (B_pad, TC)
    cosine = raw * inv_ref[...] * inv_wn_ref[...]

    if not with_labels:
        out_ref[...] = cosine * s
        return

    # clamp against float rounding pushing |cosine| slightly above 1.0
    sine = jnp.sqrt(jnp.maximum(1.0 - cosine * cosine, 0.0))
    phi = cosine * cos_m - sine * sin_m
    if easy_margin:
        phi = jnp.where(cosine > 0.0, phi, cosine)
    else:
        phi = jnp.where(cosine > th, phi, cosine - mm)

    # one_hot*phi + (1-one_hot)*cosine  ==  select on (global class == label)
    cls_idx = (lax.broadcasted_iota(jnp.int32, cosine.shape, 1)
               + pl.program_id(0) * block_c)
    out_ref[...] = jnp.where(cls_idx == lbl_ref[...], phi, cosine) * s


def arc_margin_head(feats, inv_xn, wt_pad, inv_wn_pad, labels, num_classes, *,
                    s, m, easy_margin):
    b_pad, k = feats.shape
    c_pad = wt_pad.shape[1]
    tc, c_pad_expect = _class_tile_and_pad(num_classes)
    assert c_pad == c_pad_expect, "arc weight padding / tile mismatch"
    num_tiles = c_pad // tc

    cos_m = math.cos(m)
    sin_m = math.sin(m)
    th = math.cos(math.pi - m)
    mm = math.sin(math.pi - m) * m
    with_labels = labels is not None

    # deepen the weight pipeline only when tiles are small and the grid long
    # (hides per-step DMA latency on low-HBM-BW generations like v5e)
    wt_kwargs = {}
    if tc < 1024 and num_tiles >= 4:
        wt_kwargs["pipeline_mode"] = pl.Buffered(3)

    in_specs = [
        pl.BlockSpec((b_pad, k), lambda c: (0, 0)),              # feats (repl.)
        pl.BlockSpec((b_pad, 1), lambda c: (0, 0)),              # inv feat norm
        pl.BlockSpec((k, tc), lambda c: (0, c), **wt_kwargs),    # weight stream
        pl.BlockSpec((1, tc), lambda c: (0, c)),                 # inv class norm
    ]
    args = [feats, inv_xn, wt_pad, inv_wn_pad]
    if with_labels:
        lbl = labels.reshape(-1, 1).astype(jnp.int32)
        if lbl.shape[0] != b_pad:                                # pad rows never match
            lbl = jnp.pad(lbl, ((0, b_pad - lbl.shape[0]), (0, 0)),
                          constant_values=-1)
        in_specs.append(pl.BlockSpec((b_pad, 1), lambda c: (0, 0)))
        args.append(lbl)

    kernel = functools.partial(
        _arc_head_kernel, s=float(s), cos_m=cos_m, sin_m=sin_m, th=th, mm=mm,
        easy_margin=easy_margin, with_labels=with_labels, block_c=tc)

    # weight-stream-dominated cost hint so XLA overlaps surrounding ops
    bytes_accessed = (k * c_pad * 2           # bf16 weight stream
                      + c_pad * 4             # f32 inverse class norms
                      + b_pad * k * 2         # bf16 feats (replicated)
                      + b_pad * 4             # inverse feature norms
                      + b_pad * c_pad * 4     # f32 output
                      + (b_pad * 4 if with_labels else 0))
    cost = pl.CostEstimate(
        flops=2 * b_pad * k * c_pad + 10 * b_pad * c_pad,
        transcendentals=(b_pad * c_pad if with_labels else 0),
        bytes_accessed=bytes_accessed)

    return pl.pallas_call(
        kernel,
        out_shape=jax.ShapeDtypeStruct((b_pad, c_pad), jnp.float32),
        grid_spec=pltpu.PrefetchScalarGridSpec(
            num_scalar_prefetch=0,
            grid=(num_tiles,),
            in_specs=in_specs,
            out_specs=pl.BlockSpec((b_pad, tc), lambda c: (0, c))),
        compiler_params=pltpu.CompilerParams(
            dimension_semantics=("parallel",),       # v7x: shard over 2 TCs
            vmem_limit_bytes=32 * 1024 * 1024),
        cost_estimate=cost,
    )(*args)


# ----------------------------------------------------------------------------
# Scaled-down VGG-style backbone (NHWC convs = plain-JAX glue)
# ----------------------------------------------------------------------------
def _conv_nhwc(x, w, b):
    y = lax.conv_general_dilated(
        x, w, window_strides=(1, 1), padding=((1, 1), (1, 1)),
        dimension_numbers=("NHWC", "HWIO", "NHWC"))
    return y + b.reshape(1, 1, 1, -1)


def _maxpool2x2_nhwc(x):
    return lax.reduce_window(x, -jnp.inf, lax.max,
                             window_dimensions=(1, 2, 2, 1),
                             window_strides=(1, 2, 2, 1),
                             padding="VALID")


def init_params(key, num_classes, k=512):
    ks = jax.random.split(key, 8)
    p = {"num_classes": num_classes}
    # conv stack: 3 -> 8 -> 16 -> 32 (3x3 convs, each followed by 2x2 maxpool)
    chans = [3, 8, 16, 32]
    for i in range(3):
        cin, cout = chans[i], chans[i + 1]
        std = math.sqrt(2.0 / (cin * 9))
        p[f"conv{i}_w"] = std * jax.random.normal(
            ks[i], (3, 3, cin, cout), jnp.float32)          # HWIO
        p[f"conv{i}_b"] = jnp.zeros((cout,), jnp.float32)
    # classifier stack (scaled VGG classifier): flat -> 128 -> 128 -> k
    flat = 32 * 4 * 4  # 32x32 input, three 2x2 pools -> 4x4 spatial
    dims = [flat, 128, 128, k]
    for i in range(3):
        fin, fout = dims[i], dims[i + 1]
        lim = math.sqrt(6.0 / (fin + fout))
        # stored (in, out) in bf16: canonical MXU layout, no per-call cast
        p[f"fc{i}_w"] = jax.random.uniform(
            ks[3 + i], (fin, fout), jnp.float32, -lim, lim).astype(jnp.bfloat16)
        p[f"fc{i}_b"] = jnp.zeros((1, fout), jnp.float32)
    # ArcFace class weight: xavier_uniform_ on torch layout (num_classes, k).
    #   * stored pre-transposed, zero-padded to (k, C_pad) in bf16 (halves the
    #     dominant HBM weight-stream traffic of the head)
    #   * per-class inverse L2 norms precomputed ONCE from the f32 master copy
    #     (padded classes get 0 -> their logits are exactly 0 by construction)
    lim = math.sqrt(6.0 / (k + num_classes))
    w = jax.random.uniform(ks[6], (num_classes, k), jnp.float32, -lim, lim)
    _, c_pad = _class_tile_and_pad(num_classes)
    wt = jnp.zeros((k, c_pad), jnp.float32).at[:, :num_classes].set(w.T)
    p["arc_wt"] = wt.astype(jnp.bfloat16)
    inv_wn = 1.0 / jnp.maximum(jnp.sqrt(jnp.sum(w * w, axis=1)), 1e-12)
    p["arc_inv_wn"] = jnp.zeros((1, c_pad), jnp.float32).at[0, :num_classes].set(inv_wn)
    return p


def base_net(params, x_nchw):
    # NCHW (torch-style) input -> NHWC for TPU-native convolutions
    x = jnp.transpose(x_nchw, (0, 2, 3, 1))
    for i in range(3):
        x = _conv_nhwc(x, params[f"conv{i}_w"], params[f"conv{i}_b"])
        x = jnp.maximum(x, 0.0)
        x = _maxpool2x2_nhwc(x)
    b = x.shape[0]
    x = x.reshape(b, -1)                               # (B, 512)
    # pad batch to a sublane-aligned size (>= 8) before the Pallas kernels
    b_pad = max(8, _round_up(b, 8))
    if b_pad != b:
        x = jnp.pad(x, ((0, b_pad - b), (0, 0)))
    feats, inv_xn = fused_classifier(x, params)        # one fused Pallas call
    return feats, inv_xn, b


def arc_margin_classifier_forward(params, input_images, labels=None, *,
                                  margin_m=0.5, margin_s=64, easy_margin=False):
    feats, inv_xn, b = base_net(params, input_images)
    out_pad = arc_margin_head(feats, inv_xn, params["arc_wt"],
                              params["arc_inv_wn"], labels,
                              params["num_classes"],
                              s=margin_s, m=margin_m, easy_margin=easy_margin)
    # padded rows/columns hold junk/zeros respectively -- always slice
    return out_pad[:b, :params["num_classes"]]


# ----------------------------------------------------------------------------
if __name__ == "__main__":
    num_classes = 16
    key = jax.random.PRNGKey(0)
    k_params, k_img = jax.random.split(key)

    params = init_params(k_params, num_classes)
    images = jax.random.normal(k_img, (2, 3, 32, 32), jnp.float32)   # NCHW
    labels = jnp.array([3, 7], dtype=jnp.int32)

    # training-style path (labels -> ArcFace additive-angular margin applied)
    logits = arc_margin_classifier_forward(params, images, labels)
    logits = jax.block_until_ready(logits)
    assert logits.shape == (2, num_classes) and logits.dtype == jnp.float32
    assert bool(jnp.all(jnp.isfinite(logits)))

    # inference path (labels is None -> plain scaled cosine, no label input)
    cos_s = arc_margin_classifier_forward(params, images, None)
    cos_s = jax.block_until_ready(cos_s)
    assert cos_s.shape == (2, num_classes)
    assert bool(jnp.all(jnp.isfinite(cos_s)))

    # sanity: |cosine| <= ~1 for real classes
    assert bool(jnp.all(jnp.abs(cos_s / 64.0) <= 1.01))

    print("KERNEL_OK")
</pallas_src>

<mosaic_0001>
module attributes {stable_mosaic.version = 11 : i64} {
  func.func @_mlp_kernel(%arg0: memref<8x512xf32, #tpu.memory_space<vmem>>, %arg1: memref<512x128xbf16, #tpu.memory_space<vmem>>, %arg2: memref<1x128xf32, #tpu.memory_space<vmem>>, %arg3: memref<128x128xbf16, #tpu.memory_space<vmem>>, %arg4: memref<1x128xf32, #tpu.memory_space<vmem>>, %arg5: memref<128x512xbf16, #tpu.memory_space<vmem>>, %arg6: memref<1x512xf32, #tpu.memory_space<vmem>>, %arg7: memref<8x512xbf16, #tpu.memory_space<vmem>>, %arg8: memref<8x1xf32, #tpu.memory_space<vmem>>) attributes {dimension_semantics = [], scalar_prefetch = 0 : i64, scratch_operands = 0 : i64, tpu.core_type = #tpu.core_type<tc>} {
    %c0 = arith.constant 0 : index
    %c0_0 = arith.constant 0 : index
    %0 = vector.load %arg0[%c0, %c0_0] : memref<8x512xf32, #tpu.memory_space<vmem>>, vector<8x512xf32>
    %1 = arith.truncf %0 : vector<8x512xf32> to vector<8x512xbf16>
    %c0_1 = arith.constant 0 : index
    %c0_2 = arith.constant 0 : index
    %2 = vector.load %arg1[%c0_1, %c0_2] : memref<512x128xbf16, #tpu.memory_space<vmem>>, vector<512x128xbf16>
    %cst = arith.constant dense<0.000000e+00> : vector<8x128xf32>
    %3 = tpu.matmul %1, %2, %cst {dimension_numbers = #tpu.dot_dimension_numbers<[1], [0], [0], [1], [0, 0, 1, 1], [], []>} : vector<8x512xbf16>, vector<512x128xbf16>, vector<8x128xf32> -> vector<8x128xf32>
    %c0_3 = arith.constant 0 : index
    %c0_4 = arith.constant 0 : index
    %4 = vector.load %arg2[%c0_3, %c0_4] : memref<1x128xf32, #tpu.memory_space<vmem>>, vector<1x128xf32>
    %5 = vector.broadcast %4 : vector<1x128xf32> to vector<8x128xf32>
    %6 = arith.addf %3, %5 : vector<8x128xf32>
    %cst_5 = arith.constant 0.000000e+00 : f32
    %7 = vector.broadcast %cst_5 : f32 to vector<8x128xf32>
    %8 = arith.maximumf %6, %7 : vector<8x128xf32>
    %9 = arith.truncf %8 : vector<8x128xf32> to vector<8x128xbf16>
    %c0_6 = arith.constant 0 : index
    %c0_7 = arith.constant 0 : index
    %10 = vector.load %arg3[%c0_6, %c0_7] : memref<128x128xbf16, #tpu.memory_space<vmem>>, vector<128x128xbf16>
    %cst_8 = arith.constant dense<0.000000e+00> : vector<8x128xf32>
    %11 = tpu.matmul %9, %10, %cst_8 {dimension_numbers = #tpu.dot_dimension_numbers<[1], [0], [0], [1], [0, 0, 1, 1], [], []>} : vector<8x128xbf16>, vector<128x128xbf16>, vector<8x128xf32> -> vector<8x128xf32>
    %c0_9 = arith.constant 0 : index
    %c0_10 = arith.constant 0 : index
    %12 = vector.load %arg4[%c0_9, %c0_10] : memref<1x128xf32, #tpu.memory_space<vmem>>, vector<1x128xf32>
    %13 = vector.broadcast %12 : vector<1x128xf32> to vector<8x128xf32>
    %14 = arith.addf %11, %13 : vector<8x128xf32>
    %cst_11 = arith.constant 0.000000e+00 : f32
    %15 = vector.broadcast %cst_11 : f32 to vector<8x128xf32>
    %16 = arith.maximumf %14, %15 : vector<8x128xf32>
    %17 = arith.truncf %16 : vector<8x128xf32> to vector<8x128xbf16>
    %c0_12 = arith.constant 0 : index
    %c0_13 = arith.constant 0 : index
    %18 = vector.load %arg5[%c0_12, %c0_13] : memref<128x512xbf16, #tpu.memory_space<vmem>>, vector<128x512xbf16>
    %cst_14 = arith.constant dense<0.000000e+00> : vector<8x512xf32>
    %19 = tpu.matmul %17, %18, %cst_14 {dimension_numbers = #tpu.dot_dimension_numbers<[1], [0], [0], [1], [0, 0, 1, 1], [], []>} : vector<8x128xbf16>, vector<128x512xbf16>, vector<8x512xf32> -> vector<8x512xf32>
    %c0_15 = arith.constant 0 : index
    %c0_16 = arith.constant 0 : index
    %20 = vector.load %arg6[%c0_15, %c0_16] : memref<1x512xf32, #tpu.memory_space<vmem>>, vector<1x512xf32>
    %21 = vector.broadcast %20 : vector<1x512xf32> to vector<8x512xf32>
    %22 = arith.addf %19, %21 : vector<8x512xf32>
    %23 = arith.mulf %22, %22 : vector<8x512xf32>
    %cst_17 = arith.constant dense<0.000000e+00> : vector<8xf32>
    %24 = vector.multi_reduction <add>, %23, %cst_17 [1] : vector<8x512xf32> to vector<8xf32>
    %25 = vector.shape_cast %24 : vector<8xf32> to vector<8x1xf32>
    %cst_18 = arith.constant 1.000000e-24 : f32
    %26 = vector.broadcast %cst_18 : f32 to vector<8x1xf32>
    %27 = arith.maximumf %25, %26 : vector<8x1xf32>
    %28 = math.rsqrt %27 : vector<8x1xf32>
    %c0_19 = arith.constant 0 : index
    %c0_20 = arith.constant 0 : index
    %29 = vector.load %arg8[%c0_19, %c0_20] : memref<8x1xf32, #tpu.memory_space<vmem>>, vector<8x1xf32>
    tpu.vector_store %arg8[%c0_19, %c0_20], %28 {strides = array<i32>} : memref<8x1xf32, #tpu.memory_space<vmem>>, vector<8x1xf32>,
    %30 = arith.truncf %22 : vector<8x512xf32> to vector<8x512xbf16>
    %c0_21 = arith.constant 0 : index
    %c0_22 = arith.constant 0 : index
    %31 = vector.load %arg7[%c0_21, %c0_22] : memref<8x512xbf16, #tpu.memory_space<vmem>>, vector<8x512xbf16>
    tpu.vector_store %arg7[%c0_21, %c0_22], %30 {strides = array<i32>} : memref<8x512xbf16, #tpu.memory_space<vmem>>, vector<8x512xbf16>,
    return
  }
}

</mosaic_0001>

<bundles_post_ra>
// kernel: tpu_custom_call.1
= control target key start
LH: loop header
LB: loop body
LE: loop exit
PB: predicated region body
PF: predicated region fallthrough
CT: control target
= control target key end

     0   :  { %14 = vsyncpa [#allocation3], 0  ;;  %s1403_s0 = inlined_call_operand.hbm [shape: f32[8,512], index: 0, kind: input, shape index: {}]   ;;  %s1404_s1 = inlined_call_operand.hbm [shape: bf16[512,128], index: 1, kind: input, shape index: {}]   ;;  %s1405_s2 = inlined_call_operand.vmem [shape: f32[1,128], index: 2, kind: input, shape index: {}]   ;;  %s1406_s3 = inlined_call_operand.hbm [shape: bf16[128,128], index: 3, kind: input, shape index: {}]   ;;  %s1407_s4 = inlined_call_operand.vmem [shape: f32[1,128], index: 4, kind: input, shape index: {}]   ;;  %s1408_s5 = inlined_call_operand.hbm [shape: bf16[128,512], index: 5, kind: input, shape index: {}]   ;;  %s1409_s6 = inlined_call_operand.vmem [shape: f32[1,512], index: 6, kind: input, shape index: {}]   ;;  %s1410_s7 = inlined_call_operand.hbm [shape: bf16[8,512], index: 7, kind: output, shape index: {0}]   ;;  %s1411_s8 = inlined_call_operand.vmem [shape: f32[8,1], index: 8, kind: output, shape index: {1}]  }
   0x1   :  { %15 = vsyncpa [#allocation6], 0 }
   0x2   :  { %16 = vsyncpa [#allocation9], 0 }
   0x3   :  { %17 = vsyncpa [#allocation4], 0  ;;  %s1268_s27 = smov [#allocation5]   ;;  %s1150_s9 = scalar_lea.hbm %s1404_s1, 4096 }
   0x4   :  { %s33_s28 = sshll.u32 %s1268_s27, 4  ;;  %p1151_p0 = scmp.ne.s32.totalorder %s1404_s1, %s1150_s9  ;;  %s34_s28 = int_to_ptr.vmem [resolvable:$true] %s33_s28 }
   0x5   :  { %p1154_p1 = scmp.lt.u32.totalorder %s1150_s9, %s1404_s1 }
   0x7   :  { %p1156_p2 = pnand %p1154_p1, %p1151_p0 }
   0x9   :  { %1159 = shalt.err (!%p1156_p2)
}
   0xa   :  { %s1160_s14 = scalar_lea.vmem %s34_s28, 4096  ;;  %p1165_p4 = scmp.lt.s32.totalorder %s34_s28, %s34_s28 }
   0xb   :  { %p1161_p3 = scmp.ne.s32.totalorder %s34_s28, %s1160_s14  ;;  %p1166_p5 = scmp.lt.s32.totalorder %s1160_s14, %s1160_s14 }
   0xd   :  { %p1167_p6 = por %p1166_p5, %p1165_p4 }
   0xf   :  { %p1168_p7 = pnand %p1167_p6, %p1161_p3 }
  0x11   :  { %1171 = shalt.err (!%p1168_p7)
}
  0x12   :  { %s1269_s15 = smov 64   ;;  %s1270_s16 = smov 4  }
  0x13   :  { %39 = dma.hbm_to_vmem [thread:$0]  %s1404_s1, 4096, %s34_s28, [#allocation6], %s1269_s15, %s1269_s15, %s1270_s16  }
  0x14   :  { %s1271_s19 = smov [#allocation2]   ;;  %s1272_s21 = smov [#allocation7]  }
  0x15   :  { %s24_s20 = sshll.u32 %s1271_s19, 4  ;;  %s47_s22 = sshll.u32 %s1272_s21, 4  ;;  %s25_s20 = int_to_ptr.vmem [resolvable:$true] %s24_s20  ;;  %s48_s22 = int_to_ptr.vmem [resolvable:$true] %s47_s22 }
  0x16   :  { %s1172_s25 = scalar_lea.hbm %s1403_s0, 512 }
  0x17   :  { %p1173_p8 = scmp.ne.s32.totalorder %s1403_s0, %s1172_s25  ;;  %p1176_p9 = scmp.lt.u32.totalorder %s1172_s25, %s1403_s0 }
  0x19   :  { %p1178_p10 = pnand %p1176_p9, %p1173_p8 }
  0x1b   :  { %1181 = shalt.err (!%p1178_p10)
}
  0x1c   :  { %s1182_s1 = scalar_lea.vmem %s25_s20, 512  ;;  %p1187_p12 = scmp.lt.s32.totalorder %s25_s20, %s25_s20 }
  0x1d   :  { %p1183_p11 = scmp.ne.s32.totalorder %s25_s20, %s1182_s1  ;;  %p1188_p13 = scmp.lt.s32.totalorder %s1182_s1, %s1182_s1 }
  0x1f   :  { %p1189_p0 = por %p1188_p13, %p1187_p12 }
  0x21   :  { %p1190_p1 = pnand %p1189_p0, %p1183_p11 }
  0x23   :  { %1193 = shalt.err (!%p1190_p1)
}
  0x24   :  { %27 = dma.hbm_to_vmem [thread:$0]  %s1403_s0, 512, %s25_s20, [#allocation3]  }
  0x25   :  { %s1194_s12 = scalar_lea.hbm %s1406_s3, 1024 }
  0x26   :  { %p1195_p2 = scmp.ne.s32.totalorder %s1406_s3, %s1194_s12  ;;  %p1198_p3 = scmp.lt.u32.totalorder %s1194_s12, %s1406_s3 }
  0x28   :  { %p1200_p4 = pnand %p1198_p3, %p1195_p2 }
  0x2a   :  { %1203 = shalt.err (!%p1200_p4)
}
  0x2b   :  { %s1204_s19 = scalar_lea.vmem %s48_s22, 1024  ;;  %p1209_p6 = scmp.lt.s32.totalorder %s48_s22, %s48_s22 }
  0x2c   :  { %p1205_p5 = scmp.ne.s32.totalorder %s48_s22, %s1204_s19  ;;  %p1210_p7 = scmp.lt.s32.totalorder %s1204_s19, %s1204_s19 }
  0x2e   :  { %p1211_p8 = por %p1210_p7, %p1209_p6 }
  0x30   :  { %p1212_p9 = pnand %p1211_p8, %p1205_p5 }
  0x32   :  { %1215 = shalt.err (!%p1212_p9)
}
  0x33   :  { %53 = dma.hbm_to_vmem [thread:$0]  %s1406_s3, 1024, %s48_s22, [#allocation6], %s1269_s15, %s1269_s15, %s1270_s16  }
  0x34   :  { %s1273_s21 = smov [#allocation8]   ;;  %s1216_s26 = scalar_lea.hbm %s1408_s5, 4096 }
  0x35   :  { %s61_s23 = sshll.u32 %s1273_s21, 4  ;;  %p1217_p10 = scmp.ne.s32.totalorder %s1408_s5, %s1216_s26  ;;  %s62_s23 = int_to_ptr.vmem [resolvable:$true] %s61_s23 }
  0x36   :  { %p1220_p11 = scmp.lt.u32.totalorder %s1216_s26, %s1408_s5 }
  0x38   :  { %p1222_p12 = pnand %p1220_p11, %p1217_p10 }
  0x3a   :  { %1225 = shalt.err (!%p1222_p12)
}
  0x3b   :  { %s1226_s28 = scalar_lea.vmem %s62_s23, 4096  ;;  %p1231_p0 = scmp.lt.s32.totalorder %s62_s23, %s62_s23 }
  0x3c   :  { %p1227_p13 = scmp.ne.s32.totalorder %s62_s23, %s1226_s28  ;;  %p1232_p1 = scmp.lt.s32.totalorder %s1226_s28, %s1226_s28 }
  0x3e   :  { %p1233_p2 = por %p1232_p1, %p1231_p0 }
  0x40   :  { %p1234_p3 = pnand %p1233_p2, %p1227_p13 }
  0x42   :  { %1237 = shalt.err (!%p1234_p3)
}
  0x43   :  { %s1274_s3 = smov 256   ;;  %s1275_s15 = smov 16  }
  0x44   :  { %67 = dma.hbm_to_vmem [thread:$0]  %s1408_s5, 4096, %s62_s23, [#allocation9], %s1274_s3, %s1274_s3, %s1275_s15  }
  0x45   :  { %1260 = dma.done.wait [#allocation3], 512  }
  0x46   :  { %1261 = vsyncadd [#allocation3], 4294966784 }
  0x47   :  { %1262 = dma.done.wait [#allocation6], 5120  }
  0x48   :  { %1263 = vsyncadd [#allocation6], 4294962176 }
  0x49   :  { %1264 = dma.done.wait [#allocation9], 4096  }
  0x4a   :  { %1265 = vsyncadd [#allocation9], 4294963200  ;;  %v1060_v0 = vld [vmem:[#allocation5 + $0x40] sm:$0xff]   ;;  %v1064_v4 = vld [vmem:[#allocation5 + $0x48] sm:$0xff]   ;;  %v1276_v39 = vmov 0.0   ;;  %vm1277_vm0 = vmmov 0  }
  0x4b   :  { %v1061_v1 = vld [vmem:[#allocation5 + $0xc0] sm:$0xff]   ;;  %975 = vmatprep.subr.bf16.mxu0 %v1060_v0  ;;  %v1065_v5 = vld [vmem:[#allocation5 + $0xc8] sm:$0xff]   ;;  %v1068_v8 = vld [vmem:[#allocation5 + $0x50] sm:$0xff]  }
  0x4c   :  { %v1062_v2 = vld [vmem:[#allocation5] sm:$0xff]   ;;  %997 = vmatprep.subr.bf16.mxu1 %v1061_v1  ;;  %v1066_v6 = vld [vmem:[#allocation5 + $0x8] sm:$0xff]   ;;  %v1069_v9 = vld [vmem:[#allocation5 + $0xd0] sm:$0xff]  }
  0x4d   :  { %v1063_v3 = vld [vmem:[#allocation5 + $0x80] sm:$0xff]   ;;  %976 = vmatpush3.bf16.msra.mxu0 %v1062_v2  ;;  %v1067_v7 = vld [vmem:[#allocation5 + $0x88] sm:$0xff]   ;;  %v1070_v10 = vld [vmem:[#allocation5 + $0x10] sm:$0xff]  }
  0x4e   :  { %998 = vmatpush3.bf16.msra.mxu1 %v1063_v3  ;;  %977 = vmatprep.subr.bf16.mxu0 %v1064_v4  ;;  %v1071_v11 = vld [vmem:[#allocation5 + $0x90] sm:$0xff]   ;;  %v1072_v12 = vld [vmem:[#allocation5 + $0x58] sm:$0xff]   ;;  %v1076_v16 = vld [vmem:[#allocation5 + $0x60] sm:$0xff]  }
  0x4f   :  { %999 = vmatprep.subr.bf16.mxu1 %v1065_v5  ;;  %v1073_v13 = vld [vmem:[#allocation5 + $0xd8] sm:$0xff]   ;;  %v1077_v17 = vld [vmem:[#allocation5 + $0xe0] sm:$0xff]   ;;  %v1080_v20 = vld [vmem:[#allocation5 + $0x68] sm:$0xff]  }
  0x50   :  { %v1074_v14 = vld [vmem:[#allocation5 + $0x18] sm:$0xff]   ;;  %v1078_v18 = vld [vmem:[#allocation5 + $0x20] sm:$0xff]   ;;  %v1081_v21 = vld [vmem:[#allocation5 + $0xe8] sm:$0xff]  }
  0x51   :  { %978 = vmatpush3.bf16.msra.mxu0 %v1066_v6  ;;  %v1075_v15 = vld [vmem:[#allocation5 + $0x98] sm:$0xff]   ;;  %v1079_v19 = vld [vmem:[#allocation5 + $0xa0] sm:$0xff]   ;;  %v1082_v22 = vld [vmem:[#allocation5 + $0x28] sm:$0xff]  }
  0x52   :  { %1000 = vmatpush3.bf16.msra.mxu1 %v1067_v7  ;;  %979 = vmatprep.subr.bf16.mxu0 %v1068_v8  ;;  %v1083_v23 = vld [vmem:[#allocation5 + $0xa8] sm:$0xff]   ;;  %v1084_v24 = vld [vmem:[#allocation5 + $0x70] sm:$0xff]   ;;  %v1088_v28 = vld [vmem:[#allocation5 + $0x78] sm:$0xff]  }
  0x53   :  { %1001 = vmatprep.subr.bf16.mxu1 %v1069_v9  ;;  %v1085_v25 = vld [vmem:[#allocation5 + $0xf0] sm:$0xff]   ;;  %v1089_v29 = vld [vmem:[#allocation5 + $0xf8] sm:$0xff]   ;;  %v84_v32 = vld [vmem:[#allocation2 + $0x8] sm:$0xff] }
  0x54   :  { %v1086_v26 = vld [vmem:[#allocation5 + $0x30] sm:$0xff]   ;;  %v1090_v30 = vld [vmem:[#allocation5 + $0x38] sm:$0xff]   ;;  %v83_v34 = vld [vmem:[#allocation2] sm:$0xff]  ;;  %v88_v35 = vpack.c.bf16 %v84_v32, %v84_v32  ;;  %v1278_v32 = vmov 0  }
  0x55   :  { %980 = vmatpush3.bf16.msra.mxu0 %v1070_v10  ;;  %v1087_v27 = vld [vmem:[#allocation5 + $0xb0] sm:$0xff]   ;;  %v1091_v31 = vld [vmem:[#allocation5 + $0xb8] sm:$0xff]   ;;  %v87_v37 = vpack.c.bf16 %v83_v34, %v83_v34  ;;  %v1092_v41 = vld [vmem:[#allocation7] sm:$0xff]  }
  0x56   :  { %1002 = vmatpush3.bf16.msra.mxu1 %v1071_v11  ;;  %981 = vmatprep.subr.bf16.mxu0 %v1072_v12  ;;  %v86_v33 = vld [vmem:[#allocation2 + $0x18] sm:$0xff]  ;;  %v85_v38 = vld [vmem:[#allocation2 + $0x10] sm:$0xff]  ;;  %v1093_v42 = vld [vmem:[#allocation7 + $0x8] sm:$0xff]  }
  0x57   :  { %1003 = vmatprep.subr.bf16.mxu1 %v1073_v13  ;;  %v90_v36 = vpack.c.bf16 %v86_v33, %v86_v33  ;;  %v89_v40 = vpack.c.bf16 %v85_v38, %v85_v38  ;;  %386 = vmatprep.mubr.bf16.mxu0 %v88_v35  ;;  %v1094_v43 = vld [vmem:[#allocation7 + $0x10] sm:$0xff]   ;;  %v1095_v44 = vld [vmem:[#allocation7 + $0x18] sm:$0xff]   ;;  %v1096_v45 = vld [vmem:[#allocation7 + $0x20] sm:$0xff]  }
  0x58   :  { %v1097_v46 = vld [vmem:[#allocation7 + $0x28] sm:$0xff]   ;;  %v1098_v47 = vld [vmem:[#allocation7 + $0x30] sm:$0xff]   ;;  %v1099_v48 = vld [vmem:[#allocation7 + $0x38] sm:$0xff]  }
  0x59   :  { %982 = vmatpush3.bf16.msra.mxu0 %v1074_v14  ;;  %426 = vmatprep.mubr.bf16.mxu1 %v90_v36  ;;  %v1100_v49 = vld [vmem:[#allocation8] ss:$16 sps:$4 sm:$0xff]   ;;  %v1102_v50 = vld [vmem:[#allocation8 + $0x4] ss:$16 sps:$4 sm:$0xff]   ;;  %v1105_v51 = vld [vmem:[#allocation8 + $0xc] ss:$16 sps:$4 sm:$0xff]  }
  0x5a   :  { %1004 = vmatpush3.bf16.msra.mxu1 %v1075_v15  ;;  %983 = vmatprep.subr.bf16.mxu0 %v1076_v16  ;;  %v1108_v52 = vld [vmem:[#allocation8 + $0x24] ss:$16 sps:$4 sm:$0xff]   ;;  %v1106_v53 = vld [vmem:[#allocation8 + $0x20] ss:$16 sps:$4 sm:$0xff]   ;;  %v1103_v14 = vld [vmem:[#allocation8 + $0x8] ss:$16 sps:$4 sm:$0xff]  }
  0x5b   :  { %1005 = vmatprep.subr.bf16.mxu1 %v1077_v17  ;;  %v1114_v54 = vld [vmem:[#allocation8 + $0x44] ss:$16 sps:$4 sm:$0xff]   ;;  %v1112_v55 = vld [vmem:[#allocation8 + $0x40] ss:$16 sps:$4 sm:$0xff]   ;;  %v1111_v16 = vld [vmem:[#allocation8 + $0x2c] ss:$16 sps:$4 sm:$0xff]  }
  0x5c   :  { %v1120_v56 = vld [vmem:[#allocation8 + $0x64] ss:$16 sps:$4 sm:$0xff]   ;;  %v1118_v57 = vld [vmem:[#allocation8 + $0x60] ss:$16 sps:$4 sm:$0xff]   ;;  %v1109_v17 = vld [vmem:[#allocation8 + $0x28] ss:$16 sps:$4 sm:$0xff]  }
  0x5d   :  { %984 = vmatpush3.bf16.msra.mxu0 %v1078_v18  ;;  %v1126_v58 = vld [vmem:[#allocation8 + $0x84] ss:$16 sps:$4 sm:$0xff]   ;;  %v1124_v59 = vld [vmem:[#allocation8 + $0x80] ss:$16 sps:$4 sm:$0xff]   ;;  %v1117_v18 = vld [vmem:[#allocation8 + $0x4c] ss:$16 sps:$4 sm:$0xff]  }
  0x5e   :  { %1006 = vmatpush3.bf16.msra.mxu1 %v1079_v19  ;;  %985 = vmatprep.subr.bf16.mxu0 %v1080_v20  ;;  %v1132_v60 = vld [vmem:[#allocation8 + $0xa4] ss:$16 sps:$4 sm:$0xff]   ;;  %v1130_v61 = vld [vmem:[#allocation8 + $0xa0] ss:$16 sps:$4 sm:$0xff]   ;;  %v1115_v19 = vld [vmem:[#allocation8 + $0x48] ss:$16 sps:$4 sm:$0xff]  }
  0x5f   :  { %1007 = vmatprep.subr.bf16.mxu1 %v1081_v21  ;;  %v1138_v62 = vld [vmem:[#allocation8 + $0xc4] ss:$16 sps:$4 sm:$0xff]   ;;  %v1136_v63 = vld [vmem:[#allocation8 + $0xc0] ss:$16 sps:$4 sm:$0xff]   ;;  %v1123_v20 = vld [vmem:[#allocation8 + $0x6c] ss:$16 sps:$4 sm:$0xff]  }
  0x60   :  { %v897_v2 = vld [vmem:[%s1405_s2] ss:$0 sm:$0xff]  ;;  %v1121_v21 = vld [vmem:[#allocation8 + $0x68] ss:$16 sps:$4 sm:$0xff]  }
  0x61   :  { %986 = vmatpush3.bf16.msra.mxu0 %v1082_v22  ;;  %v1129_v22 = vld [vmem:[#allocation8 + $0x8c] ss:$16 sps:$4 sm:$0xff]   ;;  %v930_v33 = vld [vmem:[%s1407_s4] ss:$0 sm:$0xff]  ;;  %s1279_s4 = smov [#allocation10]  }
  0x62   :  { %1008 = vmatpush3.bf16.msra.mxu1 %v1083_v23  ;;  %987 = vmatprep.subr.bf16.mxu0 %v1084_v24  ;;  %v1127_v23 = vld [vmem:[#allocation8 + $0x88] ss:$16 sps:$4 sm:$0xff]   ;;  %v1135_v24 = vld [vmem:[#allocation8 + $0xac] ss:$16 sps:$4 sm:$0xff]  }
  0x63   :  { %1009 = vmatprep.subr.bf16.mxu1 %v1085_v25  ;;  %v1133_v25 = vld [vmem:[#allocation8 + $0xa8] ss:$16 sps:$4 sm:$0xff]  }
  0x65   :  { %988 = vmatpush3.bf16.msra.mxu0 %v1086_v26  ;;  %v1141_v26 = vld [vmem:[#allocation8 + $0xcc] ss:$16 sps:$4 sm:$0xff]  }
  0x66   :  { %1010 = vmatpush3.bf16.msra.mxu1 %v1087_v27  ;;  %989 = vmatprep.subr.bf16.mxu0 %v1088_v28  ;;  %v1139_v27 = vld [vmem:[#allocation8 + $0xc8] ss:$16 sps:$4 sm:$0xff]   ;;  %v1144_v28 = vld [vmem:[#allocation8 + $0xe4] ss:$16 sps:$4 sm:$0xff]  }
  0x67   :  { %1011 = vmatprep.subr.bf16.mxu1 %v1089_v29  ;;  %v1147_v29 = vld [vmem:[#allocation8 + $0xec] ss:$16 sps:$4 sm:$0xff]  }
  0x69   :  { %990 = vmatpush3.bf16.msra.mxu0 %v1090_v30  ;;  %v1142_v30 = vld [vmem:[#allocation8 + $0xe0] ss:$16 sps:$4 sm:$0xff]  }
  0x6a   :  { %1012 = vmatpush3.bf16.msra.mxu1 %v1091_v31  ;;  %1028 = vmatprep.subr.bf16.mxu0 %v1276_v39  ;;  %v1145_v31 = vld [vmem:[#allocation8 + $0xe8] ss:$16 sps:$4 sm:$0xff]  }
  0x6b   :  { %763 = vmatprep.subr.bf16.mxu1 %v1102_v50 }
  0x6c   :  { %387 = vmatmul.mubr.bf16.vlgmr.msra.gmra.mrb[0].mxu0 %v87_v37 }
  0x6d   :  { %427 = vmatmul.mubr.bf16.vlgmr.msra.gmra.mrb[0].mxu1 %v89_v40  ;;  %1029 = vmatpush3.bf16.msra.mxu0 %v1092_v41  ;;  %v583_v41 = vlaneseq }
  0x6e   :  { %1030 = vmatprep.subr.bf16.mxu0 %v1276_v39  ;;  %1044 = vmatprep.mubr.msk.bf16.mxu0 %vm1277_vm0, %v1276_v39 }
  0x6f   :  { %764 = vmatpush1.bf16.msra.mxu1 %v1100_v49  ;;  %795 = vmatprep.mubr.bf16.mxu1 %v1278_v32 }
  0x70   :  { %765 = vmatprep.subr.bf16.mxu1 %v1108_v52 }
  0x71   :  { %1031 = vmatpush3.bf16.msra.mxu0 %v1093_v42  ;;  %v584_v42 = vshrl.u32 %v583_v41, 7 }
  0x72   :  { %1032 = vmatprep.subr.bf16.mxu0 %v1276_v39 }
  0x73   :  { %766 = vmatpush1.bf16.msra.mxu1 %v1106_v53 }
  0x74   :  { %767 = vmatprep.subr.bf16.mxu1 %v1114_v54 }
  0x75   :  { %1033 = vmatpush3.bf16.msra.mxu0 %v1094_v43  ;;  %v585_v43 = vsub.s32 0, %v584_v42 }
  0x76   :  { %1034 = vmatprep.subr.bf16.mxu0 %v1276_v39 }
  0x77   :  { %768 = vmatpush1.bf16.msra.mxu1 %v1112_v55 }
  0x78   :  { %769 = vmatprep.subr.bf16.mxu1 %v1120_v56 }
  0x79   :  { %1035 = vmatpush3.bf16.msra.mxu0 %v1095_v44  ;;  %v593_v44 = vsub.s32 2, %v584_v42 }
  0x7a   :  { %1036 = vmatprep.subr.bf16.mxu0 %v1276_v39 }
  0x7b   :  { %770 = vmatpush1.bf16.msra.mxu1 %v1118_v57 }
  0x7c   :  { %771 = vmatprep.subr.bf16.mxu1 %v1126_v58 }
  0x7d   :  { %1037 = vmatpush3.bf16.msra.mxu0 %v1096_v45  ;;  %v581_v45 = vld [vmem:[%s1409_s6] sm:$0xf]  ;;  %s882_s6 = sshll.u32 %s1279_s4, 4  ;;  %s883_s6 = int_to_ptr.vmem [resolvable:$true] %s882_s6 }
  0x7e   :  { %1038 = vmatprep.subr.bf16.mxu0 %v1276_v39  ;;  %v594_v49 = vrot.slane %v581_v45, %v593_v44  ;;  %s1238_s13 = scalar_lea.vmem %s883_s6, 256  ;;  %p1243_p5 = scmp.lt.s32.totalorder %s883_s6, %s883_s6 }
  0x7f   :  { %772 = vmatpush1.bf16.msra.mxu1 %v1124_v59  ;;  %p1239_p4 = scmp.ne.s32.totalorder %s883_s6, %s1238_s13  ;;  %p1244_p6 = scmp.lt.s32.totalorder %s1238_s13, %s1238_s13 }
  0x80   :  { %773 = vmatprep.subr.bf16.mxu1 %v1132_v60 }
  0x81   :  { %1039 = vmatpush3.bf16.msra.mxu0 %v1097_v46  ;;  %v589_v46 = vsub.s32 1, %v584_v42  ;;  %p1245_p7 = por %p1244_p6, %p1243_p5 }
  0x82   :  { %1040 = vmatprep.subr.bf16.mxu0 %v1276_v39 }
  0x83   :  { %774 = vmatpush1.bf16.msra.mxu1 %v1130_v61  ;;  %v590_v50 = vrot.slane %v581_v45, %v589_v46  ;;  %p1246_p8 = pnand %p1245_p7, %p1239_p4 }
  0x84   :  { %775 = vmatprep.subr.bf16.mxu1 %v1138_v62 }
  0x85   :  { %1041 = vmatpush3.bf16.msra.mxu0 %v1098_v47  ;;  %v597_v47 = vsub.s32 3, %v584_v42 }
  0x86   :  { %1042 = vmatprep.subr.bf16.mxu0 %v1276_v39 }
  0x87   :  { %776 = vmatpush1.bf16.msra.mxu1 %v1136_v63 }
  0x88   :  { %777 = vmatprep.subr.bf16.mxu1 %v1144_v28 }
  0x89   :  { %1043 = vmatpush3.bf16.msra.mxu0 %v1099_v48  ;;  %v586_v48 = vrot.slane %v581_v45, %v585_v43 }
  0x8a   :  { %804 = vmatprep.subr.bf16.mxu0 %v1105_v51  ;;  %v598_v51 = vrot.slane %v581_v45, %v597_v47 }
  0x8b   :  { %778 = vmatpush1.bf16.msra.mxu1 %v1142_v30 }
 0x13f   :  { %v991_v0 = vpop.f32.mrb[0].mxu0 }
 0x140   :  { %v1013_v1 = vpop.f32.mrb[0].mxu1  ;;  %v992_v3 = vpop.f32.mrb[1].mxu0 }
 0x141   :  { %v1014_v4 = vpop.f32.mrb[1].mxu1  ;;  %v993_v5 = vadd.f32 %v992_v3, %v991_v0  ;;  %v994_v7 = vpop.f32.mrb[2].mxu0 }
 0x142   :  { %v1015_v6 = vadd.f32 %v1014_v4, %v1013_v1  ;;  %v1016_v8 = vpop.f32.mrb[2].mxu1  ;;  %v995_v9 = vpop.f32.mrb[3].mxu0 }
 0x143   :  { %v1017_v10 = vpop.f32.mrb[3].mxu1  ;;  %v389_v11 = vadd.f32 %v993_v5, %v897_v2 }
 0x145   :  { %v429_v12 = vadd.f32 %v1015_v6, %v389_v11 }
 0x147   :  { %v434_v13 = vmax.f32 %v429_v12, 0.0 }
 0x149   :  { %v435_v15 = vpack.c.bf16 %v434_v13, %v434_v13 }
 0x14b   :  { %1045 = vmatmul.mubr.bf16.vlgmr.msra.gmra.mrb[4].mxu0 %v435_v15 }
 0x14c   :  { %805 = vmatpush1.bf16.msra.mxu0 %v1103_v14  ;;  %836 = vmatprep.mubr.bf16.mxu0 %v1278_v32 }
 0x14d   :  { %806 = vmatprep.subr.bf16.mxu0 %v1111_v16 }
 0x150   :  { %807 = vmatpush1.bf16.msra.mxu0 %v1109_v17 }
 0x151   :  { %808 = vmatprep.subr.bf16.mxu0 %v1117_v18 }
 0x154   :  { %809 = vmatpush1.bf16.msra.mxu0 %v1115_v19 }
 0x155   :  { %810 = vmatprep.subr.bf16.mxu0 %v1123_v20 }
 0x158   :  { %811 = vmatpush1.bf16.msra.mxu0 %v1121_v21 }
 0x159   :  { %812 = vmatprep.subr.bf16.mxu0 %v1129_v22 }
 0x15c   :  { %813 = vmatpush1.bf16.msra.mxu0 %v1127_v23 }
 0x15d   :  { %814 = vmatprep.subr.bf16.mxu0 %v1135_v24 }
 0x160   :  { %815 = vmatpush1.bf16.msra.mxu0 %v1133_v25 }
 0x161   :  { %816 = vmatprep.subr.bf16.mxu0 %v1141_v26 }
 0x164   :  { %817 = vmatpush1.bf16.msra.mxu0 %v1139_v27 }
 0x165   :  { %818 = vmatprep.subr.bf16.mxu0 %v1147_v29 }
 0x168   :  { %819 = vmatpush1.bf16.msra.mxu0 %v1145_v31 }
 0x21e   :  { %v541_v34 = vpop.f32.mrb[4].mxu0 }
 0x21f   :  { %v542_v35 = vadd.f32 %v930_v33, %v541_v34  ;;  %v1046_v36 = vpop.f32.mrb[5].mxu0 }
 0x220   :  { %v544_v37 = vpop.f32.mrb[6].mxu0 }
 0x221   :  { %v547_v38 = vmax.f32 %v542_v35, 0.0  ;;  %v1047_v39 = vpop.f32.mrb[7].mxu0 }
 0x223   :  { %v548_v40 = vpack.c.bf16 %v547_v38, %v547_v38 }
 0x225   :  { %796 = vmatmul.mubr.bf16.vlgmr.msra.gmra.mrb[4].mxu1 %v548_v40  ;;  %837 = vmatmul.mubr.bf16.vlgmr.msra.gmra.mrb[8].mxu0 %v548_v40 }
 0x2f8   :  { %v797_v52 = vpop.f32.mrb[4].mxu1  ;;  %v838_v53 = vpop.f32.mrb[8].mxu0 }
 0x2f9   :  { %v798_v54 = vadd.f32 %v797_v52, %v586_v48  ;;  %v839_v55 = vadd.f32 %v838_v53, %v594_v49  ;;  %v799_v56 = vpop.f32.mrb[5].mxu1  ;;  %v840_v57 = vpop.f32.mrb[9].mxu0 }
 0x2fa   :  { %v800_v58 = vadd.f32 %v799_v56, %v590_v50  ;;  %v841_v59 = vadd.f32 %v840_v57, %v598_v51  ;;  %v801_v60 = vpop.f32.mrb[6].mxu1  ;;  %v842_v61 = vpop.f32.mrb[10].mxu0 }
 0x2fb   :  { %v845_v62 = vmul.f32 %v798_v54, %v798_v54  ;;  %v802_v63 = vpop.f32.mrb[7].mxu1  ;;  %v843_v0 = vpop.f32.mrb[11].mxu0  ;;  %v847_v4 = vmul.f32 %v839_v55, %v839_v55 }
 0x2fc   :  { %v846_v1 = vmul.f32 %v800_v58, %v800_v58  ;;  %v973_v2 = vpack.c.bf16 %v800_v58, %v798_v54  ;;  %v974_v3 = vpack.c.bf16 %v841_v59, %v839_v55  ;;  %v848_v6 = vmul.f32 %v841_v59, %v841_v59 }
 0x2fe   :  { %874 = vst [vmem:[#allocation10] sm:$0xff] %v973_v2  ;;  %875 = vst [vmem:[#allocation10 + $0x8] sm:$0xff] %v974_v3  ;;  %v849_v5 = vadd.f32 %v846_v1, %v845_v62 }
 0x300   :  { %v850_v7 = vadd.f32 %v849_v5, %v847_v4 }
 0x302   :  { %v851_v8 = vadd.f32 %v850_v7, %v848_v6 }
 0x304   :  { %852 = vadd.xlane.f32.xlu0 %v851_v8 }
 0x305   :  { %1249 = shalt.err (!%p1246_p8)
}
 0x306   :  { %s1250_s18 = scalar_lea.hbm %s1410_s7, 256 }
 0x307   :  { %p1251_p9 = scmp.ne.s32.totalorder %s1410_s7, %s1250_s18  ;;  %p1254_p10 = scmp.lt.u32.totalorder %s1250_s18, %s1410_s7 }
 0x309   :  { %p1256_p11 = pnand %p1254_p10, %p1251_p9 }
 0x30b   :  { %1259 = shalt.err (!%p1256_p11)
}
 0x30c   :  { %885 = dma.vmem_to_hbm [thread:$0]  %s883_s6, 256, %s1410_s7, [#allocation4]   ;;  %vm856_vm1 = vcmask 7168  }
 0x391   :  { %v853_v9 = vpop.xlane.xlu0 %852 }
 0x392   :  { %v854_v10 = vmax.f32 %v853_v9, 1e-24 }
 0x394   :  { %1148 = vrsqrt.f32 %v854_v10 }
 0x39e   :  { %v1149_v11 = vpop.eup %1148 }
 0x39f   :  { %857 = vst.msk [vmem:[%s1411_s8] sm:$0xff] %vm856_vm1, %v1149_v11 }
 0x3a0   :  { %1266 = dma.done.wait [#allocation4], 256  }
 0x3a1   :  { %1267 = vsyncadd [#allocation4], 4294967040 }
 0x3a2   :  { %893 = vsyncpa [#allocation3], 1 }
 0x3a3   :  { %894 = vsyncpa [#allocation6], 1 }
 0x3a4   :  { %895 = vsyncpa [#allocation9], 1 }
 0x3a5   :  { %896 = vsyncpa [#allocation4], 1 }

</bundles_post_ra>
